<compile_context>
chip_gen: v7x
topology: tpu7x:2x2x1
jax: 0.10.0
libtpu: 0.0.40
codegen_flags: <defaults>
</compile_context>

<pallas_src>
import functools

import jax
import jax.numpy as jnp
from jax.experimental import pallas as pl
from jax.experimental.pallas import tpu as pltpu


def _resnet1d_backward_kernel(x_ref, w_ref, b_ref, o_ref, *,
                              order, Nb, L, Cp, K, pad):
    # x_ref: (Nb, L, Cp)   input tile (Nb batch elements)
    # w_ref: (K, Cp, Cp)   conv weights, tap-major
    # b_ref: (1, Cp)       conv bias
    # o_ref: (Nb, L, Cp)   output tile
    M = Nb * L
    x = x_ref[...].reshape(M, Cp)                        # aligned collapse (L % 8 == 0)

    # Hoisted loop invariants: bias broadcast + per-tap edge-validity masks.
    bias_full = jnp.broadcast_to(b_ref[...], (M, Cp)).astype(jnp.float32)
    l_idx = jax.lax.broadcasted_iota(jnp.int32, (M, Cp), 0) % L
    masks = []
    for k in range(K):
        s = k - pad                                      # tap offset in sequence
        if s > 0:
            masks.append(l_idx < (L - s))
        elif s < 0:
            masks.append(l_idx >= (-s))
        else:
            masks.append(None)

    z = x
    for _ in range(order):                               # static unroll over `order`
        acc = bias_full
        for k in range(K):                               # static unroll over taps
            # Matmul on the aligned z buffer, then shift the *result* rows.
            yk = jnp.dot(z, w_ref[k], preferred_element_type=jnp.float32)
            shift = (pad - k) % M                        # row r of output takes yk[r + k - pad]
            if shift != 0:
                yk = pltpu.roll(yk, shift=shift, axis=0)
            if masks[k] is not None:
                # Rows whose source index falls outside this batch element's
                # [0, L) window correspond to conv zero-padding -> mask to 0.
                yk = jnp.where(masks[k], yk, 0.0)
            acc = acc + yk
        z = x - acc.astype(x.dtype)                      # torch.sub(x, y)

    o_ref[...] = z.reshape(Nb, L, Cp).astype(o_ref.dtype)


def resnet1d_backward(x_nlc, w_kcc, bias_c, *, order):
    """x_nlc: (N, L, C) f32, w_kcc: (K, C_in, C_out), bias_c: (C_out,)."""
    N, L, C = x_nlc.shape
    K = w_kcc.shape[0]
    pad = (K - 1) // 2   # NOTE: matches PyTorch 'same' conv only for odd K.

    # Lane-dense channel padding (multiple of 128).  Padded channels stay
    # exactly zero through every iteration (zero weights/bias/inputs).
    LANE = 128
    Cp = ((C + LANE - 1) // LANE) * LANE

    # Pick Nb batch elements per grid step so M = Nb*L is large enough to feed
    # the MXU and amortize per-step overhead, while the block stays VMEM-sized.
    # (On v7x's 64 MiB VMEM, shrink target_rows / raise grid extent as needed.)
    target_rows = 512
    Nb = 1
    for cand in range(N, 0, -1):
        if N % cand == 0 and cand * L <= max(target_rows, L):
            Nb = cand
            break

    x_p = jnp.pad(x_nlc, ((0, 0), (0, 0), (0, Cp - C)))
    w_p = jnp.pad(w_kcc, ((0, 0), (0, Cp - C), (0, Cp - C)))
    b_p = jnp.pad(bias_c, (0, Cp - C)).reshape(1, Cp)

    kernel = functools.partial(_resnet1d_backward_kernel,
                               order=order, Nb=Nb, L=L, Cp=Cp, K=K, pad=pad)

    out_p = pl.pallas_call(
        kernel,
        out_shape=jax.ShapeDtypeStruct((N, L, Cp), x_nlc.dtype),
        grid_spec=pltpu.PrefetchScalarGridSpec(
            num_scalar_prefetch=0,
            grid=(N // Nb,),
            in_specs=[
                pl.BlockSpec((Nb, L, Cp), lambda n: (n, 0, 0)),   # x
                pl.BlockSpec((K, Cp, Cp), lambda n: (0, 0, 0)),   # conv weight
                pl.BlockSpec((1, Cp), lambda n: (0, 0)),          # conv bias
            ],
            out_specs=pl.BlockSpec((Nb, L, Cp), lambda n: (n, 0, 0)),
        ),
        compiler_params=pltpu.CompilerParams(
            dimension_semantics=("parallel",)),
    )(x_p, w_p, b_p)

    return out_p[:, :, :C]


def _reference(x_nlc, w_kcc, bias_c, *, order):
    """Pure-JAX reference of the same forward (for validation)."""
    N, L, C = x_nlc.shape
    K = w_kcc.shape[0]
    pad = (K - 1) // 2
    z = x_nlc
    for _ in range(order):
        zp = jnp.pad(z, ((0, 0), (pad, pad), (0, 0)))
        y = bias_c[None, None, :]
        for k in range(K):
            y = y + jnp.einsum("nlc,cd->nld", zp[:, k:k + L, :], w_kcc[k],
                               precision=jax.lax.Precision.HIGHEST)
        z = x_nlc - y
    return z


if __name__ == "__main__":
    # Small deterministic shapes consistent with a 1D ResNet block:
    #   batch N=2, channels C=8, length L=16, conv kernel K=3, order=2.
    N, C, L, K = 2, 8, 16, 3
    ORDER = 2

    key = jax.random.PRNGKey(0)
    kx, kw, kb = jax.random.split(key, 3)

    # PyTorch-layout input (N, C, L) -> kernel layout (N, L, C).
    x_ncl = jax.random.normal(kx, (N, C, L), dtype=jnp.float32)
    x_nlc = jnp.transpose(x_ncl, (0, 2, 1))

    # PyTorch Conv1d weight (C_out, C_in, K) -> (K, C_in, C_out); bias (C_out,).
    w_torch = 0.1 * jax.random.normal(kw, (C, C, K), dtype=jnp.float32)
    w_kcc = jnp.transpose(w_torch, (2, 1, 0))
    bias_c = 0.05 * jax.random.normal(kb, (C,), dtype=jnp.float32)

    out = resnet1d_backward(x_nlc, w_kcc, bias_c, order=ORDER)
    out = jax.block_until_ready(out)

    ref = _reference(x_nlc, w_kcc, bias_c, order=ORDER)
    assert out.shape == (N, L, C)
    assert jnp.allclose(out, ref, atol=1e-5, rtol=1e-5), "mismatch vs reference"

    print("KERNEL_OK")
</pallas_src>

<mosaic_0001>
module attributes {stable_mosaic.version = 11 : i64} {
  func.func @_resnet1d_backward_kernel(%arg0: i32, %arg1: memref<2x16x128xf32, #tpu.memory_space<vmem>>, %arg2: memref<3x128x128xf32, #tpu.memory_space<vmem>>, %arg3: memref<1x128xf32, #tpu.memory_space<vmem>>, %arg4: memref<2x16x128xf32, #tpu.memory_space<vmem>>) attributes {dimension_semantics = [#tpu.dimension_semantics<parallel>], iteration_bounds = array<i64: 1>, scalar_prefetch = 0 : i64, scratch_operands = 0 : i64, tpu.core_type = #tpu.core_type<tc>, window_params = [{transform_indices = @transform_0, window_bounds = array<i64: 2, 16, 128>}, {pipeline_mode = #tpu.pipeline_mode<synchronous>, transform_indices = @transform_1, window_bounds = array<i64: 3, 128, 128>}, {pipeline_mode = #tpu.pipeline_mode<synchronous>, transform_indices = @transform_2, window_bounds = array<i64: 1, 128>}, {transform_indices = @transform_3, window_bounds = array<i64: 2, 16, 128>}]} {
    %c0 = arith.constant 0 : index
    %c0_0 = arith.constant 0 : index
    %c0_1 = arith.constant 0 : index
    %0 = vector.load %arg1[%c0, %c0_0, %c0_1] : memref<2x16x128xf32, #tpu.memory_space<vmem>>, vector<2x16x128xf32>
    %1 = vector.shape_cast %0 : vector<2x16x128xf32> to vector<32x128xf32>
    %c0_2 = arith.constant 0 : index
    %c0_3 = arith.constant 0 : index
    %2 = vector.load %arg3[%c0_2, %c0_3] : memref<1x128xf32, #tpu.memory_space<vmem>>, vector<1x128xf32>
    %3 = vector.shape_cast %2 : vector<1x128xf32> to vector<1x128xf32>
    %4 = vector.broadcast %3 : vector<1x128xf32> to vector<32x128xf32>
    %5 = tpu.iota {dimensions = array<i32: 0>} : vector<32x128xi32>
    %c16_i32 = arith.constant 16 : i32
    %c0_i32 = arith.constant 0 : i32
    %6 = arith.cmpi eq, %c16_i32, %c0_i32 : i32
    %c1_i32 = arith.constant 1 : i32
    %7 = arith.select %6, %c1_i32, %c16_i32 : i32
    %8 = vector.broadcast %7 : i32 to vector<32x128xi32>
    %9 = arith.remsi %5, %8 : vector<32x128xi32>
    %c0_i32_4 = arith.constant 0 : i32
    %10 = vector.broadcast %c0_i32_4 : i32 to vector<32x128xi32>
    %11 = arith.cmpi ne, %9, %10 : vector<32x128xi32>
    %c0_i32_5 = arith.constant 0 : i32
    %12 = vector.broadcast %c0_i32_5 : i32 to vector<32x128xi32>
    %13 = arith.cmpi slt, %9, %12 : vector<32x128xi32>
    %c0_i32_6 = arith.constant 0 : i32
    %14 = arith.cmpi slt, %7, %c0_i32_6 : i32
    %15 = vector.broadcast %14 : i1 to vector<32x128xi1>
    %16 = vector.broadcast %15 : vector<32x128xi1> to vector<32x128xi1>
    %17 = arith.xori %13, %16 : vector<32x128xi1>
    %18 = arith.andi %17, %11 : vector<32x128xi1>
    %19 = vector.broadcast %7 : i32 to vector<32x128xi32>
    %20 = arith.addi %9, %19 : vector<32x128xi32>
    %21 = arith.select %18, %20, %9 : vector<32x128xi1>, vector<32x128xi32>
    %c1_i32_7 = arith.constant 1 : i32
    %22 = vector.broadcast %c1_i32_7 : i32 to vector<32x128xi32>
    %23 = arith.cmpi sge, %21, %22 : vector<32x128xi32>
    %c15_i32 = arith.constant 15 : i32
    %24 = vector.broadcast %c15_i32 : i32 to vector<32x128xi32>
    %25 = arith.cmpi slt, %21, %24 : vector<32x128xi32>
    %c0_8 = arith.constant 0 : index
    %c0_9 = arith.constant 0 : index
    %c0_10 = arith.constant 0 : index
    %26 = vector.load %arg2[%c0_8, %c0_9, %c0_10] : memref<3x128x128xf32, #tpu.memory_space<vmem>>, vector<1x128x128xf32>
    %27 = vector.shape_cast %26 : vector<1x128x128xf32> to vector<128x128xf32>
    %cst = arith.constant dense<0.000000e+00> : vector<32x128xf32>
    %28 = tpu.matmul %1, %27, %cst {dimension_numbers = #tpu.dot_dimension_numbers<[1], [0], [0], [1], [0, 0, 1, 1], [], []>} : vector<32x128xf32>, vector<128x128xf32>, vector<32x128xf32> -> vector<32x128xf32>
    %c1_i32_11 = arith.constant 1 : i32
    %29 = tpu.dynamic_rotate %28 by %c1_i32_11 dim 0 : vector<32x128xf32>, i32 -> vector<32x128xf32>
    %cst_12 = arith.constant 0.000000e+00 : f32
    %30 = vector.broadcast %cst_12 : f32 to vector<32x128xf32>
    %31 = arith.select %23, %29, %30 : vector<32x128xi1>, vector<32x128xf32>
    %32 = arith.addf %4, %31 : vector<32x128xf32>
    %c1 = arith.constant 1 : index
    %c0_13 = arith.constant 0 : index
    %c0_14 = arith.constant 0 : index
    %33 = vector.load %arg2[%c1, %c0_13, %c0_14] : memref<3x128x128xf32, #tpu.memory_space<vmem>>, vector<1x128x128xf32>
    %34 = vector.shape_cast %33 : vector<1x128x128xf32> to vector<128x128xf32>
    %cst_15 = arith.constant dense<0.000000e+00> : vector<32x128xf32>
    %35 = tpu.matmul %1, %34, %cst_15 {dimension_numbers = #tpu.dot_dimension_numbers<[1], [0], [0], [1], [0, 0, 1, 1], [], []>} : vector<32x128xf32>, vector<128x128xf32>, vector<32x128xf32> -> vector<32x128xf32>
    %36 = arith.addf %32, %35 : vector<32x128xf32>
    %c2 = arith.constant 2 : index
    %c0_16 = arith.constant 0 : index
    %c0_17 = arith.constant 0 : index
    %37 = vector.load %arg2[%c2, %c0_16, %c0_17] : memref<3x128x128xf32, #tpu.memory_space<vmem>>, vector<1x128x128xf32>
    %38 = vector.shape_cast %37 : vector<1x128x128xf32> to vector<128x128xf32>
    %cst_18 = arith.constant dense<0.000000e+00> : vector<32x128xf32>
    %39 = tpu.matmul %1, %38, %cst_18 {dimension_numbers = #tpu.dot_dimension_numbers<[1], [0], [0], [1], [0, 0, 1, 1], [], []>} : vector<32x128xf32>, vector<128x128xf32>, vector<32x128xf32> -> vector<32x128xf32>
    %c31_i32 = arith.constant 31 : i32
    %40 = tpu.dynamic_rotate %39 by %c31_i32 dim 0 : vector<32x128xf32>, i32 -> vector<32x128xf32>
    %cst_19 = arith.constant 0.000000e+00 : f32
    %41 = vector.broadcast %cst_19 : f32 to vector<32x128xf32>
    %42 = arith.select %25, %40, %41 : vector<32x128xi1>, vector<32x128xf32>
    %43 = arith.addf %36, %42 : vector<32x128xf32>
    %44 = arith.subf %1, %43 : vector<32x128xf32>
    %c0_20 = arith.constant 0 : index
    %c0_21 = arith.constant 0 : index
    %c0_22 = arith.constant 0 : index
    %45 = vector.load %arg2[%c0_20, %c0_21, %c0_22] : memref<3x128x128xf32, #tpu.memory_space<vmem>>, vector<1x128x128xf32>
    %46 = vector.shape_cast %45 : vector<1x128x128xf32> to vector<128x128xf32>
    %cst_23 = arith.constant dense<0.000000e+00> : vector<32x128xf32>
    %47 = tpu.matmul %44, %46, %cst_23 {dimension_numbers = #tpu.dot_dimension_numbers<[1], [0], [0], [1], [0, 0, 1, 1], [], []>} : vector<32x128xf32>, vector<128x128xf32>, vector<32x128xf32> -> vector<32x128xf32>
    %c1_i32_24 = arith.constant 1 : i32
    %48 = tpu.dynamic_rotate %47 by %c1_i32_24 dim 0 : vector<32x128xf32>, i32 -> vector<32x128xf32>
    %cst_25 = arith.constant 0.000000e+00 : f32
    %49 = vector.broadcast %cst_25 : f32 to vector<32x128xf32>
    %50 = arith.select %23, %48, %49 : vector<32x128xi1>, vector<32x128xf32>
    %51 = arith.addf %4, %50 : vector<32x128xf32>
    %c1_26 = arith.constant 1 : index
    %c0_27 = arith.constant 0 : index
    %c0_28 = arith.constant 0 : index
    %52 = vector.load %arg2[%c1_26, %c0_27, %c0_28] : memref<3x128x128xf32, #tpu.memory_space<vmem>>, vector<1x128x128xf32>
    %53 = vector.shape_cast %52 : vector<1x128x128xf32> to vector<128x128xf32>
    %cst_29 = arith.constant dense<0.000000e+00> : vector<32x128xf32>
    %54 = tpu.matmul %44, %53, %cst_29 {dimension_numbers = #tpu.dot_dimension_numbers<[1], [0], [0], [1], [0, 0, 1, 1], [], []>} : vector<32x128xf32>, vector<128x128xf32>, vector<32x128xf32> -> vector<32x128xf32>
    %55 = arith.addf %51, %54 : vector<32x128xf32>
    %c2_30 = arith.constant 2 : index
    %c0_31 = arith.constant 0 : index
    %c0_32 = arith.constant 0 : index
    %56 = vector.load %arg2[%c2_30, %c0_31, %c0_32] : memref<3x128x128xf32, #tpu.memory_space<vmem>>, vector<1x128x128xf32>
    %57 = vector.shape_cast %56 : vector<1x128x128xf32> to vector<128x128xf32>
    %cst_33 = arith.constant dense<0.000000e+00> : vector<32x128xf32>
    %58 = tpu.matmul %44, %57, %cst_33 {dimension_numbers = #tpu.dot_dimension_numbers<[1], [0], [0], [1], [0, 0, 1, 1], [], []>} : vector<32x128xf32>, vector<128x128xf32>, vector<32x128xf32> -> vector<32x128xf32>
    %c31_i32_34 = arith.constant 31 : i32
    %59 = tpu.dynamic_rotate %58 by %c31_i32_34 dim 0 : vector<32x128xf32>, i32 -> vector<32x128xf32>
    %cst_35 = arith.constant 0.000000e+00 : f32
    %60 = vector.broadcast %cst_35 : f32 to vector<32x128xf32>
    %61 = arith.select %25, %59, %60 : vector<32x128xi1>, vector<32x128xf32>
    %62 = arith.addf %55, %61 : vector<32x128xf32>
    %63 = arith.subf %1, %62 : vector<32x128xf32>
    %64 = vector.shape_cast %63 : vector<32x128xf32> to vector<2x16x128xf32>
    %c0_36 = arith.constant 0 : index
    %c0_37 = arith.constant 0 : index
    %c0_38 = arith.constant 0 : index
    %65 = vector.load %arg4[%c0_36, %c0_37, %c0_38] : memref<2x16x128xf32, #tpu.memory_space<vmem>>, vector<2x16x128xf32>
    tpu.vector_store %arg4[%c0_36, %c0_37, %c0_38], %64 {strides = array<i32>} : memref<2x16x128xf32, #tpu.memory_space<vmem>>, vector<2x16x128xf32>,
    return
  }
  func.func @transform_0(%arg0: i32) -> (i32, i32, i32) {
    %c0_i32 = arith.constant 0 : i32
    %c0_i32_0 = arith.constant 0 : i32
    %c0_i32_1 = arith.constant 0 : i32
    return %arg0, %c0_i32, %c0_i32_0 : i32, i32, i32
  }
  func.func @transform_1(%arg0: i32) -> (i32, i32, i32) {
    %c0_i32 = arith.constant 0 : i32
    %c0_i32_0 = arith.constant 0 : i32
    %c0_i32_1 = arith.constant 0 : i32
    %c0_i32_2 = arith.constant 0 : i32
    return %c0_i32, %c0_i32_0, %c0_i32_1 : i32, i32, i32
  }
  func.func @transform_2(%arg0: i32) -> (i32, i32) {
    %c0_i32 = arith.constant 0 : i32
    %c0_i32_0 = arith.constant 0 : i32
    %c0_i32_1 = arith.constant 0 : i32
    return %c0_i32, %c0_i32_0 : i32, i32
  }
  func.func @transform_3(%arg0: i32) -> (i32, i32, i32) {
    %c0_i32 = arith.constant 0 : i32
    %c0_i32_0 = arith.constant 0 : i32
    %c0_i32_1 = arith.constant 0 : i32
    return %arg0, %c0_i32, %c0_i32_0 : i32, i32, i32
  }
}

</mosaic_0001>

<bundles_post_ra>
// kernel: tpu_custom_call.1
= control target key start
LH: loop header
LB: loop body
LE: loop exit
PB: predicated region body
PF: predicated region fallthrough
CT: control target
= control target key end

     0   :  { %8 = vsyncpa [#allocation3], 0  ;;  %s1724_s0 = inlined_call_operand.hbm [shape: f32[2,16,128], index: 0, kind: input, shape index: {}]   ;;  %s1725_s1 = inlined_call_operand.hbm [shape: f32[3,128,128], index: 1, kind: input, shape index: {}]   ;;  %s1726_s2 = inlined_call_operand.vmem [shape: f32[1,128], index: 2, kind: input, shape index: {}]   ;;  %s1727_s3 = inlined_call_operand.hbm [shape: f32[2,16,128], index: 3, kind: output, shape index: {}]  }
   0x1   :  { %9 = vsyncpa [#allocation6], 0 }
   0x2   :  { %10 = vsyncpa [#allocation4], 0  ;;  %s1397_s12 = smov [#allocation2]   ;;  %s1325_s16 = scalar_lea.hbm %s1724_s0, 512 }
   0x3   :  { %s16_s13 = sshll.u32 %s1397_s12, 4  ;;  %p1326_p0 = scmp.ne.s32.totalorder %s1724_s0, %s1325_s16  ;;  %s17_s13 = int_to_ptr.vmem [resolvable:$true] %s16_s13 }
   0x4   :  { %p1329_p1 = scmp.lt.u32.totalorder %s1325_s16, %s1724_s0 }
   0x6   :  { %p1331_p2 = pnand %p1329_p1, %p1326_p0 }
   0x8   :  { %1334 = shalt.err (!%p1331_p2)
}
   0x9   :  { %s1335_s21 = scalar_lea.vmem %s17_s13, 512  ;;  %p1340_p4 = scmp.lt.s32.totalorder %s17_s13, %s17_s13 }
   0xa   :  { %p1336_p3 = scmp.ne.s32.totalorder %s17_s13, %s1335_s21  ;;  %p1341_p5 = scmp.lt.s32.totalorder %s1335_s21, %s1335_s21 }
   0xc   :  { %p1342_p6 = por %p1341_p5, %p1340_p4 }
   0xe   :  { %p1343_p7 = pnand %p1342_p6, %p1336_p3 }
  0x10   :  { %1346 = shalt.err (!%p1343_p7)
}
  0x11   :  { %s1398_s22 = smov 128   ;;  %s1399_s23 = smov 8  }
  0x12   :  { %22 = dma.hbm_to_vmem [thread:$0]  %s1724_s0, 512, %s17_s13, [#allocation3], %s1398_s22, %s1398_s22, %s1399_s23  }
  0x13   :  { %s1400_s26 = smov [#allocation5]   ;;  %s1347_s30 = scalar_lea.hbm %s1725_s1, 6144 }
  0x14   :  { %s28_s27 = sshll.u32 %s1400_s26, 4  ;;  %p1348_p8 = scmp.ne.s32.totalorder %s1725_s1, %s1347_s30  ;;  %s29_s27 = int_to_ptr.vmem [resolvable:$true] %s28_s27 }
  0x15   :  { %p1351_p9 = scmp.lt.u32.totalorder %s1347_s30, %s1725_s1 }
  0x17   :  { %p1353_p10 = pnand %p1351_p9, %p1348_p8 }
  0x19   :  { %1356 = shalt.err (!%p1353_p10)
}
  0x1a   :  { %s1357_s8 = scalar_lea.vmem %s29_s27, 6144  ;;  %p1362_p12 = scmp.lt.s32.totalorder %s29_s27, %s29_s27 }
  0x1b   :  { %p1358_p11 = scmp.ne.s32.totalorder %s29_s27, %s1357_s8  ;;  %p1363_p13 = scmp.lt.s32.totalorder %s1357_s8, %s1357_s8 }
  0x1d   :  { %p1364_p0 = por %p1363_p13, %p1362_p12 }
  0x1f   :  { %p1365_p1 = pnand %p1364_p0, %p1358_p11 }
  0x21   :  { %1368 = shalt.err (!%p1365_p1)
}
  0x22   :  { %34 = dma.hbm_to_vmem [thread:$0]  %s1725_s1, 6144, %s29_s27, [#allocation6], %s1398_s22, %s1398_s22, %s1399_s23  }
  0x23   :  { %1391 = dma.done.wait [#allocation3], 512  }
  0x24   :  { %1392 = vsyncadd [#allocation3], 4294966784 }
  0x25   :  { %1393 = dma.done.wait [#allocation6], 6144  }
  0x26   :  { %1394 = vsyncadd [#allocation6], 4294961152  ;;  %v115_v0 = vld [vmem:[#allocation5] sm:$0xff]  ;;  %v116_v1 = vld [vmem:[#allocation5 + $0x8] sm:$0xff] }
  0x27   :  { %v117_v2 = vld [vmem:[#allocation5 + $0x10] sm:$0xff]  ;;  %v1452_v3 = vpack.c.bf16 %v116_v1, %v115_v0  ;;  %v118_v4 = vld [vmem:[#allocation5 + $0x18] sm:$0xff]  ;;  %v234_v5 = vld [vmem:[#allocation5 + $0x80] sm:$0xff] }
  0x28   :  { %v235_v6 = vld [vmem:[#allocation5 + $0x88] sm:$0xff]  ;;  %v1454_v7 = vpack.c.bf16 %v118_v4, %v117_v2  ;;  %v119_v9 = vld [vmem:[#allocation5 + $0x20] sm:$0xff]  ;;  %v236_v11 = vld [vmem:[#allocation5 + $0x90] sm:$0xff] }
  0x29   :  { %v1456_v8 = vpack.c.bf16 %v235_v6, %v234_v5  ;;  %v120_v10 = vld [vmem:[#allocation5 + $0x28] sm:$0xff]  ;;  %1129 = vmatprep.subr.bf16.mxu0 %v1452_v3  ;;  %v237_v12 = vld [vmem:[#allocation5 + $0x98] sm:$0xff]  ;;  %v238_v14 = vld [vmem:[#allocation5 + $0xa0] sm:$0xff] }
  0x2a   :  { %1131 = vmatpush3.bf16.msra.mxu0 %v1452_v3  ;;  %v1461_v13 = vpack.c.bf16 %v237_v12, %v236_v11  ;;  %v239_v15 = vld [vmem:[#allocation5 + $0xa8] sm:$0xff]  ;;  %v1465_v16 = vpack.c.bf16 %v120_v10, %v119_v9  ;;  %v121_v17 = vld [vmem:[#allocation5 + $0x30] sm:$0xff]  ;;  %v122_v18 = vld [vmem:[#allocation5 + $0x38] sm:$0xff] }
  0x2b   :  { %1161 = vmatprep.subr.bf16.mxu1 %v1456_v8  ;;  %1133 = vmatprep.subr.bf16.mxu0 %v1454_v7  ;;  %v1468_v19 = vpack.c.bf16 %v239_v15, %v238_v14  ;;  %v240_v20 = vld [vmem:[#allocation5 + $0xb0] sm:$0xff]  ;;  %v241_v21 = vld [vmem:[#allocation5 + $0xb8] sm:$0xff]  ;;  %v1473_v22 = vpack.c.bf16 %v122_v18, %v121_v17  ;;  %v123_v23 = vld [vmem:[#allocation5 + $0x40] sm:$0xff] }
  0x2c   :  { %1163 = vmatpush3.bf16.msra.mxu1 %v1456_v8  ;;  %v124_v24 = vld [vmem:[#allocation5 + $0x48] sm:$0xff]  ;;  %v1476_v25 = vpack.c.bf16 %v241_v21, %v240_v20  ;;  %v1478_v26 = vld [vmem:[#allocation2] sm:$0xff]  ;;  %v125_v30 = vld [vmem:[#allocation5 + $0x50] sm:$0xff] }
  0x2d   :  { %1165 = vmatprep.subr.bf16.mxu1 %v1461_v13  ;;  %v242_v27 = vld [vmem:[#allocation5 + $0xc0] sm:$0xff]  ;;  %v243_v28 = vld [vmem:[#allocation5 + $0xc8] sm:$0xff]  ;;  %932 = vmatprep.mubr.f32.mxu0 %v1478_v26  ;;  %v1485_v29 = vpack.c.bf16 %v124_v24, %v123_v23  ;;  %v126_v31 = vld [vmem:[#allocation5 + $0x58] sm:$0xff] }
  0x2e   :  { %1135 = vmatpush3.bf16.msra.mxu0 %v1454_v7  ;;  %970 = vmatprep.mubr.f32.mxu1 %v1478_v26  ;;  %v1488_v32 = vpack.c.bf16 %v243_v28, %v242_v27  ;;  %v244_v33 = vld [vmem:[#allocation5 + $0xd0] sm:$0xff]  ;;  %v245_v34 = vld [vmem:[#allocation5 + $0xd8] sm:$0xff]  ;;  %v1493_v35 = vpack.c.bf16 %v126_v31, %v125_v30  ;;  %v127_v36 = vld [vmem:[#allocation5 + $0x60] sm:$0xff] }
  0x2f   :  { %1137 = vmatprep.subr.bf16.mxu0 %v1465_v16  ;;  %v128_v37 = vld [vmem:[#allocation5 + $0x68] sm:$0xff]  ;;  %v1496_v38 = vpack.c.bf16 %v245_v34, %v244_v33  ;;  %v246_v39 = vld [vmem:[#allocation5 + $0xe0] sm:$0xff]  ;;  %v129_v42 = vld [vmem:[#allocation5 + $0x70] sm:$0xff] }
  0x30   :  { %1167 = vmatpush3.bf16.msra.mxu1 %v1461_v13  ;;  %v247_v40 = vld [vmem:[#allocation5 + $0xe8] sm:$0xff]  ;;  %v1501_v41 = vpack.c.bf16 %v128_v37, %v127_v36  ;;  %v130_v43 = vld [vmem:[#allocation5 + $0x78] sm:$0xff]  ;;  %v248_v45 = vld [vmem:[#allocation5 + $0xf0] sm:$0xff] }
  0x31   :  { %1169 = vmatprep.subr.bf16.mxu1 %v1468_v19  ;;  %v1504_v44 = vpack.c.bf16 %v247_v40, %v246_v39  ;;  %v249_v46 = vld [vmem:[#allocation5 + $0xf8] sm:$0xff]  ;;  %v1509_v47 = vpack.c.bf16 %v130_v43, %v129_v42  ;;  %v340_v48 = vld [vmem:[#allocation5 + $0x100] sm:$0xff]  ;;  %v341_v49 = vld [vmem:[#allocation5 + $0x108] sm:$0xff] }
  0x32   :  { %1139 = vmatpush3.bf16.msra.mxu0 %v1465_v16  ;;  %v1512_v50 = vpack.c.bf16 %v249_v46, %v248_v45  ;;  %v1517_v51 = vpack.c.bf16 %v341_v49, %v340_v48  ;;  %v342_v52 = vld [vmem:[#allocation5 + $0x110] sm:$0xff]  ;;  %v343_v53 = vld [vmem:[#allocation5 + $0x118] sm:$0xff]  ;;  %v1521_v54 = vld [vmem:[#allocation2 + $0x8] sm:$0xff] }
  0x33   :  { %1141 = vmatprep.subr.bf16.mxu0 %v1473_v22  ;;  %v1524_v55 = vld [vmem:[#allocation2 + $0x10] sm:$0xff]  ;;  %v1527_v56 = vpack.c.bf16 %v343_v53, %v342_v52  ;;  %v344_v57 = vld [vmem:[#allocation5 + $0x120] sm:$0xff]  ;;  %v345_v58 = vld [vmem:[#allocation5 + $0x128] sm:$0xff] }
  0x34   :  { %1171 = vmatpush3.bf16.msra.mxu1 %v1468_v19  ;;  %v1533_v59 = vld [vmem:[#allocation2 + $0x18] sm:$0xff]  ;;  %v1537_v60 = vpack.c.bf16 %v345_v58, %v344_v57  ;;  %v346_v61 = vld [vmem:[#allocation5 + $0x130] sm:$0xff]  ;;  %v348_v0 = vld [vmem:[#allocation5 + $0x140] sm:$0xff] }
  0x35   :  { %1173 = vmatprep.subr.bf16.mxu1 %v1476_v25  ;;  %v347_v62 = vld [vmem:[#allocation5 + $0x138] sm:$0xff]  ;;  %v349_v1 = vld [vmem:[#allocation5 + $0x148] sm:$0xff]  ;;  %v352_v6 = vld [vmem:[#allocation5 + $0x160] sm:$0xff] }
  0x36   :  { %1143 = vmatpush3.bf16.msra.mxu0 %v1473_v22  ;;  %v1547_v63 = vpack.c.bf16 %v347_v62, %v346_v61  ;;  %v1553_v2 = vpack.c.bf16 %v349_v1, %v348_v0  ;;  %v351_v4 = vld [vmem:[#allocation5 + $0x158] sm:$0xff]  ;;  %v354_v10 = vld [vmem:[#allocation5 + $0x170] sm:$0xff]  ;;  %v1609_v20 = vld [vmem:[%s1726_s2] ss:$0 sm:$0xff]  ;;  %s1401_s2 = smov [#allocation7]  }
  0x37   :  { %1145 = vmatprep.subr.bf16.mxu0 %v1485_v29  ;;  %v355_v11 = vld [vmem:[#allocation5 + $0x178] sm:$0xff]  ;;  %s766_s11 = sshll.u32 %s1401_s2, 4  ;;  %s767_s11 = int_to_ptr.vmem [resolvable:$true] %s766_s11 }
  0x38   :  { %1175 = vmatpush3.bf16.msra.mxu1 %v1476_v25  ;;  %v1571_v12 = vpack.c.bf16 %v355_v11, %v354_v10  ;;  %s1369_s12 = scalar_lea.vmem %s767_s11, 512  ;;  %p1374_p3 = scmp.lt.s32.totalorder %s767_s11, %s767_s11 }
  0x39   :  { %1177 = vmatprep.subr.bf16.mxu1 %v1488_v32  ;;  %p1370_p2 = scmp.ne.s32.totalorder %s767_s11, %s1369_s12  ;;  %p1375_p4 = scmp.lt.s32.totalorder %s1369_s12, %s1369_s12 }
  0x3a   :  { %1147 = vmatpush3.bf16.msra.mxu0 %v1485_v29 }
  0x3b   :  { %1149 = vmatprep.subr.bf16.mxu0 %v1493_v35  ;;  %p1376_p5 = por %p1375_p4, %p1374_p3 }
  0x3c   :  { %1179 = vmatpush3.bf16.msra.mxu1 %v1488_v32 }
  0x3d   :  { %1181 = vmatprep.subr.bf16.mxu1 %v1496_v38  ;;  %p1377_p6 = pnand %p1376_p5, %p1370_p2 }
  0x3e   :  { %1151 = vmatpush3.bf16.msra.mxu0 %v1493_v35 }
  0x3f   :  { %1153 = vmatprep.subr.bf16.mxu0 %v1501_v41 }
  0x40   :  { %1183 = vmatpush3.bf16.msra.mxu1 %v1496_v38 }
  0x41   :  { %1185 = vmatprep.subr.bf16.mxu1 %v1504_v44 }
  0x42   :  { %1155 = vmatpush3.bf16.msra.mxu0 %v1501_v41 }
  0x43   :  { %1157 = vmatprep.subr.bf16.mxu0 %v1509_v47 }
  0x44   :  { %1187 = vmatpush3.bf16.msra.mxu1 %v1504_v44 }
  0x45   :  { %1189 = vmatprep.subr.bf16.mxu1 %v1512_v50 }
  0x46   :  { %1159 = vmatpush3.bf16.msra.mxu0 %v1509_v47 }
  0x47   :  { %1193 = vmatprep.subr.bf16.mxu0 %v1517_v51 }
  0x48   :  { %1191 = vmatpush3.bf16.msra.mxu1 %v1512_v50 }
  0x49   :  { %1225 = vmatprep.subr.bf16.mxu1 %v1452_v3  ;;  %933 = vmatmul.mubr.f32.vlgmr.msra.gmra.mrb[0].mxu0 %v1521_v54 }
  0x4a   :  { %1195 = vmatpush3.bf16.msra.mxu0 %v1517_v51  ;;  %935 = vmatprep.mubr.f32.mxu0 %v1524_v55 }
  0x4b   :  { %1197 = vmatprep.subr.bf16.mxu0 %v1527_v56  ;;  %971 = vmatmul.mubr.f32.vlgmr.msra.gmra.mrb[0].mxu1 %v1521_v54 }
  0x4c   :  { %973 = vmatprep.mubr.f32.mxu1 %v1524_v55  ;;  %1227 = vmatpush3.bf16.msra.mxu1 %v1452_v3  ;;  %v350_v3 = vld [vmem:[#allocation5 + $0x150] sm:$0xff] }
  0x4d   :  { %936 = vmatmul.mubr.f32.gmra.mrb[2].mxu0 %v1533_v59  ;;  %1229 = vmatprep.subr.bf16.mxu1 %v1454_v7  ;;  %v1559_v5 = vpack.c.bf16 %v351_v4, %v350_v3 }
  0x4e   :  { %1199 = vmatpush3.bf16.msra.mxu0 %v1527_v56  ;;  %1008 = vmatprep.mubr.f32.mxu0 %v1478_v26 }
  0x4f   :  { %1201 = vmatprep.subr.bf16.mxu0 %v1537_v60  ;;  %974 = vmatmul.mubr.f32.gmra.mrb[2].mxu1 %v1533_v59 }
  0x50   :  { %1231 = vmatpush3.bf16.msra.mxu1 %v1454_v7  ;;  %v353_v7 = vld [vmem:[#allocation5 + $0x168] sm:$0xff] }
  0x51   :  { %1233 = vmatprep.subr.bf16.mxu1 %v1465_v16  ;;  %v1565_v9 = vpack.c.bf16 %v353_v7, %v352_v6 }
  0x52   :  { %1203 = vmatpush3.bf16.msra.mxu0 %v1537_v60 }
  0x53   :  { %1205 = vmatprep.subr.bf16.mxu0 %v1547_v63 }
  0x54   :  { %1235 = vmatpush3.bf16.msra.mxu1 %v1465_v16 }
  0x55   :  { %1237 = vmatprep.subr.bf16.mxu1 %v1473_v22 }
  0x56   :  { %1207 = vmatpush3.bf16.msra.mxu0 %v1547_v63 }
  0x57   :  { %1209 = vmatprep.subr.bf16.mxu0 %v1553_v2 }
  0x58   :  { %1239 = vmatpush3.bf16.msra.mxu1 %v1473_v22 }
  0x59   :  { %1241 = vmatprep.subr.bf16.mxu1 %v1485_v29 }
  0x5a   :  { %1211 = vmatpush3.bf16.msra.mxu0 %v1553_v2 }
  0x5b   :  { %1213 = vmatprep.subr.bf16.mxu0 %v1559_v5 }
  0x5c   :  { %1243 = vmatpush3.bf16.msra.mxu1 %v1485_v29 }
  0x5d   :  { %1245 = vmatprep.subr.bf16.mxu1 %v1493_v35 }
  0x5e   :  { %1215 = vmatpush3.bf16.msra.mxu0 %v1559_v5 }
  0x5f   :  { %1217 = vmatprep.subr.bf16.mxu0 %v1565_v9 }
  0x60   :  { %1247 = vmatpush3.bf16.msra.mxu1 %v1493_v35 }
  0x61   :  { %1249 = vmatprep.subr.bf16.mxu1 %v1501_v41 }
  0x62   :  { %1219 = vmatpush3.bf16.msra.mxu0 %v1565_v9 }
  0x63   :  { %1221 = vmatprep.subr.bf16.mxu0 %v1571_v12 }
  0x64   :  { %1251 = vmatpush3.bf16.msra.mxu1 %v1501_v41 }
  0x65   :  { %1253 = vmatprep.subr.bf16.mxu1 %v1509_v47 }
  0x66   :  { %1223 = vmatpush3.bf16.msra.mxu0 %v1571_v12 }
  0x67   :  { %1257 = vmatprep.subr.bf16.mxu0 %v1456_v8 }
  0x68   :  { %1255 = vmatpush3.bf16.msra.mxu1 %v1509_v47 }
  0x69   :  { %1009 = vmatmul.mubr.f32.vlgmr.msra.gmra.mrb[4].mxu0 %v1521_v54  ;;  %1289 = vmatprep.subr.bf16.mxu1 %v1517_v51 }
  0x6a   :  { %1011 = vmatprep.mubr.f32.mxu0 %v1524_v55  ;;  %1259 = vmatpush3.bf16.msra.mxu0 %v1456_v8  ;;  %v54_v8 = vlaneseq }
  0x6b   :  { %1261 = vmatprep.subr.bf16.mxu0 %v1461_v13 }
  0x6d   :  { %1012 = vmatmul.mubr.f32.gmra.mrb[6].mxu0 %v1533_v59 }
  0x6e   :  { %1263 = vmatpush3.bf16.msra.mxu0 %v1461_v13  ;;  %v1601_v13 = vshrl.u32 %v54_v8, 7 }
  0x6f   :  { %1265 = vmatprep.subr.bf16.mxu0 %v1468_v19 }
  0x70   :  { %v57_v14 = vadd.s32 16, %v1601_v13  ;;  %vm220_vm0 = vcmp.lt.s32.totalorder %v1601_v13, 1  ;;  %v63_v18 = vand.u32 15, %v1601_v13  ;;  %v58_v47 = vadd.s32 24, %v1601_v13 }
  0x71   :  { %v56_v48 = vadd.s32 8, %v1601_v13  ;;  %vm445_vm3 = vcmp.lt.s32.totalorder %v1601_v13, 7 }
  0x72   :  { %1267 = vmatpush3.bf16.msra.mxu0 %v1468_v19  ;;  %v77_v22 = vand.u32 15, %v57_v14  ;;  %vm1614_vm1 = vcmp.ge.s32.totalorder %v63_v18, 1  ;;  %v84_v53 = vand.u32 15, %v58_v47 }
  0x73   :  { %1269 = vmatprep.subr.bf16.mxu0 %v1476_v25  ;;  %v70_v58 = vand.u32 15, %v56_v48 }
  0x74   :  { %vm1618_vm2 = vcmp.ge.s32.totalorder %v77_v22, 1  ;;  %vm1640_vm4 = vcmp.lt.s32.totalorder %v84_v53, 15 }
  0x75   :  { %vm1644_vm5 = vcmp.lt.s32.totalorder %v70_v58, 15 }
  0x76   :  { %1271 = vmatpush3.bf16.msra.mxu0 %v1476_v25 }
  0x77   :  { %1273 = vmatprep.subr.bf16.mxu0 %v1488_v32 }
  0x7a   :  { %1275 = vmatpush3.bf16.msra.mxu0 %v1488_v32 }
  0x7b   :  { %1277 = vmatprep.subr.bf16.mxu0 %v1496_v38 }
  0x7e   :  { %1279 = vmatpush3.bf16.msra.mxu0 %v1496_v38 }
  0x7f   :  { %1281 = vmatprep.subr.bf16.mxu0 %v1504_v44 }
  0x82   :  { %1283 = vmatpush3.bf16.msra.mxu0 %v1504_v44 }
  0x83   :  { %1285 = vmatprep.subr.bf16.mxu0 %v1512_v50 }
  0x86   :  { %1287 = vmatpush3.bf16.msra.mxu0 %v1512_v50 }
 0x11c   :  { %v934_v15 = vpop.f32.mrb[0].mxu0 }
 0x11d   :  { %v217_v16 = vrot.slane %v934_v15, 7  ;;  %v197_v17 = vpop.f32.mrb[1].mxu0 }
 0x11e   :  { %v216_v19 = vrot.slane %v197_v17, 7  ;;  %v972_v21 = vpop.f32.mrb[0].mxu1 }
 0x11f   :  { %v316_v23 = vpop.f32.mrb[1].mxu1 }
 0x120   :  { %v937_v24 = vpop.f32.mrb[2].mxu0  ;;  %v223_v25 = vsel %vm220_vm0, %v216_v19, %v217_v16 }
 0x121   :  { %v219_v27 = vrot.slane %v937_v24, 7  ;;  %v207_v28 = vpop.f32.mrb[3].mxu0  ;;  %v230_v29 = vadd.f32 %v1609_v20, %v223_v25 }
 0x122   :  { %v218_v31 = vrot.slane %v207_v28, 7  ;;  %v975_v32 = vpop.f32.mrb[2].mxu1 }
 0x123   :  { %v336_v34 = vadd.f32 %v972_v21, %v230_v29  ;;  %v224_v35 = vsel %vm220_vm0, %v219_v27, %v216_v19  ;;  %v326_v36 = vpop.f32.mrb[3].mxu1 }
 0x124   :  { %v225_v37 = vsel %vm1614_vm1, %v224_v35, 0.0  ;;  %v221_v38 = vsel %vm220_vm0, %v218_v31, %v219_v27  ;;  %v222_v39 = vsel %vm220_vm0, %v217_v16, %v218_v31 }
 0x125   :  { %v229_v40 = vadd.f32 %v1609_v20, %v225_v37  ;;  %v232_v41 = vadd.f32 %v1609_v20, %v221_v38  ;;  %v227_v42 = vsel %vm1618_vm2, %v222_v39, 0.0 }
 0x126   :  { %v231_v43 = vadd.f32 %v1609_v20, %v227_v42 }
 0x127   :  { %v335_v44 = vadd.f32 %v316_v23, %v229_v40  ;;  %v338_v45 = vadd.f32 %v975_v32, %v232_v41 }
 0x128   :  { %v337_v46 = vadd.f32 %v326_v36, %v231_v43 }
 0x13c   :  { %v1010_v49 = vpop.f32.mrb[4].mxu0 }
 0x13d   :  { %v442_v50 = vrot.slane %v1010_v49, 1  ;;  %v422_v52 = vpop.f32.mrb[5].mxu0 }
 0x13e   :  { %v441_v57 = vrot.slane %v422_v52, 1 }
 0x140   :  { %v448_v61 = vsel %vm445_vm3, %v441_v57, %v442_v50  ;;  %v1013_v62 = vpop.f32.mrb[6].mxu0 }
 0x141   :  { %v444_v1 = vrot.slane %v1013_v62, 1  ;;  %v432_v3 = vpop.f32.mrb[7].mxu0  ;;  %v454_v4 = vadd.f32 %v448_v61, %v335_v44 }
 0x142   :  { %v443_v7 = vrot.slane %v432_v3, 1 }
 0x143   :  { %v449_v10 = vsel %vm445_vm3, %v444_v1, %v441_v57  ;;  %v458_v11 = vsub.f32 %v1478_v26, %v454_v4 }
 0x144   :  { %v453_v8 = vsel %vm1640_vm4, %v449_v10, 0.0  ;;  %v446_v14 = vsel %vm445_vm3, %v443_v7, %v444_v1  ;;  %v447_v15 = vsel %vm445_vm3, %v442_v50, %v443_v7 }
 0x145   :  { %v451_v16 = vsel %vm1644_vm5, %v447_v15, 0.0  ;;  %1046 = vmatprep.mubr.f32.mxu1 %v458_v11  ;;  %1084 = vmatprep.mubr.f32.mxu0 %v458_v11  ;;  %v456_v17 = vadd.f32 %v446_v14, %v337_v46  ;;  %v457_v18 = vadd.f32 %v453_v8, %v338_v45 }
 0x146   :  { %v455_v19 = vadd.f32 %v451_v16, %v336_v34 }
 0x147   :  { %v460_v22 = vsub.f32 %v1524_v55, %v456_v17  ;;  %v461_v23 = vsub.f32 %v1533_v59, %v457_v18 }
 0x148   :  { %v459_v21 = vsub.f32 %v1521_v54, %v455_v19 }
 0x14a   :  { %1047 = vmatmul.mubr.f32.vlgmr.msra.gmra.mrb[4].mxu1 %v459_v21  ;;  %1085 = vmatmul.mubr.f32.vlgmr.msra.gmra.mrb[8].mxu0 %v459_v21 }
 0x14b   :  { %1291 = vmatpush3.bf16.msra.mxu1 %v1517_v51  ;;  %1049 = vmatprep.mubr.f32.mxu1 %v460_v22 }
 0x14c   :  { %1087 = vmatprep.mubr.f32.mxu0 %v460_v22  ;;  %1293 = vmatprep.subr.bf16.mxu1 %v1527_v56 }
 0x14e   :  { %1050 = vmatmul.mubr.f32.gmra.mrb[6].mxu1 %v461_v23  ;;  %1088 = vmatmul.mubr.f32.gmra.mrb[10].mxu0 %v461_v23 }
 0x14f   :  { %1295 = vmatpush3.bf16.msra.mxu1 %v1527_v56  ;;  %1122 = vmatprep.mubr.f32.mxu1 %v458_v11 }
 0x150   :  { %1297 = vmatprep.subr.bf16.mxu1 %v1537_v60 }
 0x153   :  { %1299 = vmatpush3.bf16.msra.mxu1 %v1537_v60 }
 0x154   :  { %1301 = vmatprep.subr.bf16.mxu1 %v1547_v63 }
 0x157   :  { %1303 = vmatpush3.bf16.msra.mxu1 %v1547_v63 }
 0x158   :  { %1305 = vmatprep.subr.bf16.mxu1 %v1553_v2 }
 0x15b   :  { %1307 = vmatpush3.bf16.msra.mxu1 %v1553_v2 }
 0x15c   :  { %1309 = vmatprep.subr.bf16.mxu1 %v1559_v5 }
 0x15f   :  { %1311 = vmatpush3.bf16.msra.mxu1 %v1559_v5 }
 0x160   :  { %1313 = vmatprep.subr.bf16.mxu1 %v1565_v9 }
 0x163   :  { %1315 = vmatpush3.bf16.msra.mxu1 %v1565_v9 }
 0x164   :  { %1317 = vmatprep.subr.bf16.mxu1 %v1571_v12 }
 0x167   :  { %1319 = vmatpush3.bf16.msra.mxu1 %v1571_v12 }
 0x16a   :  { %1123 = vmatmul.mubr.f32.vlgmr.msra.gmra.mrb[8].mxu1 %v459_v21 }
 0x16b   :  { %1125 = vmatprep.mubr.f32.mxu1 %v460_v22 }
 0x16e   :  { %1126 = vmatmul.mubr.f32.gmra.mrb[10].mxu1 %v461_v23 }
 0x21d   :  { %v1048_v51 = vpop.f32.mrb[4].mxu1  ;;  %v1086_v56 = vpop.f32.mrb[8].mxu0 }
 0x21e   :  { %v548_v60 = vrot.slane %v1048_v51, 7  ;;  %v528_v63 = vpop.f32.mrb[5].mxu1  ;;  %v629_v2 = vpop.f32.mrb[9].mxu0 }
 0x21f   :  { %v547_v24 = vrot.slane %v528_v63, 7 }
 0x221   :  { %v553_v5 = vsel %vm220_vm0, %v547_v24, %v548_v60  ;;  %v1051_v25 = vpop.f32.mrb[6].mxu1  ;;  %v1089_v27 = vpop.f32.mrb[10].mxu0 }
 0x222   :  { %v560_v9 = vadd.f32 %v1609_v20, %v553_v5  ;;  %v550_v28 = vrot.slane %v1051_v25, 7  ;;  %v538_v29 = vpop.f32.mrb[7].mxu1  ;;  %v639_v31 = vpop.f32.mrb[11].mxu0 }
 0x223   :  { %v549_v12 = vrot.slane %v538_v29, 7 }
 0x224   :  { %v649_v32 = vadd.f32 %v1086_v56, %v560_v9  ;;  %v554_v34 = vsel %vm220_vm0, %v550_v28, %v547_v24 }
 0x225   :  { %v555_v35 = vsel %vm1614_vm1, %v554_v34, 0.0  ;;  %v551_v36 = vsel %vm220_vm0, %v549_v12, %v550_v28  ;;  %v552_v37 = vsel %vm220_vm0, %v548_v60, %v549_v12 }
 0x226   :  { %v559_v38 = vadd.f32 %v1609_v20, %v555_v35  ;;  %v562_v39 = vadd.f32 %v1609_v20, %v551_v36  ;;  %v557_v40 = vsel %vm1618_vm2, %v552_v37, 0.0 }
 0x227   :  { %v561_v41 = vadd.f32 %v1609_v20, %v557_v40 }
 0x228   :  { %v651_v42 = vadd.f32 %v1089_v27, %v562_v39  ;;  %v648_v43 = vadd.f32 %v629_v2, %v559_v38 }
 0x229   :  { %v650_v44 = vadd.f32 %v639_v31, %v561_v41 }
 0x23d   :  { %v1124_v30 = vpop.f32.mrb[8].mxu1 }
 0x23e   :  { %v738_v45 = vrot.slane %v1124_v30, 1  ;;  %v718_v46 = vpop.f32.mrb[9].mxu1 }
 0x23f   :  { %v737_v47 = vrot.slane %v718_v46, 1 }
 0x241   :  { %v743_v48 = vsel %vm445_vm3, %v737_v47, %v738_v45  ;;  %v1127_v49 = vpop.f32.mrb[10].mxu1 }
 0x242   :  { %v749_v50 = vadd.f32 %v743_v48, %v648_v43  ;;  %v740_v52 = vrot.slane %v1127_v49, 1  ;;  %v728_v53 = vpop.f32.mrb[11].mxu1 }
 0x243   :  { %v739_v57 = vrot.slane %v728_v53, 1 }
 0x244   :  { %v753_v33 = vsub.f32 %v1478_v26, %v749_v50  ;;  %v744_v20 = vsel %vm445_vm3, %v740_v52, %v737_v47 }
 0x245   :  { %v748_v58 = vsel %vm1640_vm4, %v744_v20, 0.0  ;;  %v741_v61 = vsel %vm445_vm3, %v739_v57, %v740_v52  ;;  %v742_v62 = vsel %vm445_vm3, %v738_v45, %v739_v57 }
 0x246   :  { %757 = vst [vmem:[#allocation7] sm:$0xff] %v753_v33  ;;  %v752_v1 = vadd.f32 %v748_v58, %v651_v42  ;;  %v746_v3 = vsel %vm1644_vm5, %v742_v62, 0.0  ;;  %v751_v4 = vadd.f32 %v741_v61, %v650_v44 }
 0x247   :  { %v750_v26 = vadd.f32 %v746_v3, %v649_v32 }
 0x248   :  { %v756_v7 = vsub.f32 %v1533_v59, %v752_v1  ;;  %v755_v0 = vsub.f32 %v1524_v55, %v751_v4 }
 0x249   :  { %v754_v10 = vsub.f32 %v1521_v54, %v750_v26 }
 0x24a   :  { %760 = vst [vmem:[#allocation7 + $0x18] sm:$0xff] %v756_v7  ;;  %759 = vst [vmem:[#allocation7 + $0x10] sm:$0xff] %v755_v0 }
 0x24b   :  { %758 = vst [vmem:[#allocation7 + $0x8] sm:$0xff] %v754_v10 }
 0x24c   :  { %1380 = shalt.err (!%p1377_p6)
}
 0x24d   :  { %s1381_s15 = scalar_lea.hbm %s1727_s3, 512 }
 0x24e   :  { %p1382_p7 = scmp.ne.s32.totalorder %s1727_s3, %s1381_s15  ;;  %p1385_p8 = scmp.lt.u32.totalorder %s1381_s15, %s1727_s3 }
 0x250   :  { %p1387_p9 = pnand %p1385_p8, %p1382_p7 }
 0x252   :  { %1390 = shalt.err (!%p1387_p9)
}
 0x253   :  { %772 = dma.vmem_to_hbm [thread:$0]  %s767_s11, 512, %s1727_s3, [#allocation4], %s1398_s22, %s1398_s22, %s1399_s23  }
 0x254   :  { %1395 = dma.done.wait [#allocation4], 512  }
 0x255   :  { %1396 = vsyncadd [#allocation4], 4294966784 }
 0x256   :  { %776 = vsyncpa [#allocation3], 1 }
 0x257   :  { %777 = vsyncpa [#allocation6], 1 }
 0x258   :  { %778 = vsyncpa [#allocation4], 1 }

</bundles_post_ra>
